<compile_context>
chip_gen: v7x
topology: tpu7x:2x2x1
jax: 0.10.0
libtpu: 0.0.40
codegen_flags: <defaults>
</compile_context>

<pallas_src>
import math
import functools
import numpy as np
import jax
import jax.numpy as jnp
from jax.experimental import pallas as pl
from jax.experimental.pallas import tpu as pltpu

# ---- small, module-consistent hyperparameters -------------------------------
OUTPUT_DIM  = 50      # vocab size
EMB_DIM     = 32
HID_DIM     = 32      # packing below relies on EMB_DIM == HID_DIM
N_LAYERS    = 2
KERNEL_SIZE = 3
TRG_PAD_IDX = 1
MAX_LENGTH  = 100
BATCH       = 2
TRG_LEN     = 8
SRC_LEN     = 8
SCALE       = math.sqrt(0.5)   # torch.sqrt(FloatTensor([0.5]))

LANE = 128


def _round_up(x, m):
    return ((x + m - 1) // m) * m


# ---- Pallas kernel (everything after the embedding gather) ------------------
def decoder_kernel(emb_ref, enck_ref, encz_ref, mask_ref,
                   proj_w_ref, conv_w_ref, bias_ref, w_out_ref,
                   out_ref, attn_ref,
                   *, n_layers, ksize, seq_len, pad_val):
    embedded = emb_ref[...]        # [B*T, E]          f32  (batch folded on sublanes)
    enc_kT   = enck_ref[...]       # [E, B*S_PAD]      bf16 (per-batch keys lane-concat)
    enc_comb = encz_ref[...]       # [B*S_PAD, E]      bf16
    add_mask = mask_ref[...]       # [B*T, B*S_PAD]    f32  block-diag additive mask
    biases   = bias_ref[...]       # [3+2L+1, V_PAD]   f32
    w_out    = w_out_ref[...]      # [H, V_PAD]        bf16 (fused hid2emb @ fc_out)

    bt, emb_dim = embedded.shape
    hid = proj_w_ref.shape[-1]
    scale = jnp.float32(SCALE)

    def bdot(a, w_bf16):
        # bf16 operands on the MXU, f32 accumulation; elementwise stays f32.
        return jnp.dot(a.astype(jnp.bfloat16), w_bf16,
                       preferred_element_type=jnp.float32)

    b_e2h  = biases[0:1, :hid]
    b_ah2e = biases[1:2, :emb_dim]
    b_ae2h = biases[2:3, :hid]
    b_out  = biases[3 + 2 * n_layers:4 + 2 * n_layers, :]

    # conv_input = emb2hid(embedded)                                   [B*T, H]
    conv_input = bdot(embedded, proj_w_ref[0]) + b_e2h

    # row index *within* each folded batch element: the sublane roll below must
    # not leak rows across the batch boundary.
    row_idx = jax.lax.broadcasted_iota(jnp.int32, (bt, hid), 0)
    if (seq_len & (seq_len - 1)) == 0:
        row_in_batch = row_idx & (seq_len - 1)
    else:
        row_in_batch = jax.lax.rem(row_idx, jnp.int32(seq_len))

    attention = jnp.zeros((bt, enc_kT.shape[1]), jnp.float32)

    for layer in range(n_layers):
        # Causal Conv1d: lane-concatenate the K rolled + pad-masked copies of
        # conv_input into ONE [B*T, K*H] operand -> 2 matmuls (value, gate)
        # per layer instead of 6 tiny ones.
        pieces = []
        for k in range(ksize):
            shift = ksize - 1 - k
            if shift == 0:
                pieces.append(conv_input)
            else:
                rolled = pltpu.roll(conv_input, shift=shift, axis=0)
                pieces.append(jnp.where(row_in_batch < shift,
                                        jnp.float32(pad_val), rolled))
        x_cat = jnp.concatenate(pieces, axis=-1).astype(jnp.bfloat16)  # [B*T, K*H]

        val  = jnp.dot(x_cat, conv_w_ref[2 * layer],
                       preferred_element_type=jnp.float32) \
               + biases[3 + layer:4 + layer, :hid]
        gate = jnp.dot(x_cat, conv_w_ref[2 * layer + 1],
                       preferred_element_type=jnp.float32) \
               + biases[3 + n_layers + layer:4 + n_layers + layer, :hid]
        conved = val * jax.nn.sigmoid(gate)                            # [B*T, H]

        # --- calculate_attention (both batch elements in one matmul) --------
        conved_emb = bdot(conved, proj_w_ref[1]) + b_ah2e              # [B*T, E]
        combined = (conved_emb + embedded) * scale
        energy = bdot(combined, enc_kT) + add_mask                     # [B*T, B*S_PAD]
        energy = energy - jnp.max(energy, axis=-1, keepdims=True)
        p = jnp.exp(energy)
        attention = p / jnp.sum(p, axis=-1, keepdims=True)             # exact softmax
        attended = bdot(attention, enc_comb)                           # [B*T, E]
        attended = bdot(attended, proj_w_ref[2]) + b_ae2h              # [B*T, H]
        conved = (conved + attended) * scale
        # ---------------------------------------------------------------------

        conved = (conved + conv_input) * scale                         # residual
        conv_input = conved

    logits = bdot(conv_input, w_out) + b_out                           # [B*T, V_PAD]
    out_ref[...]  = logits.astype(out_ref.dtype)
    attn_ref[...] = attention.astype(attn_ref.dtype)


# ---- one-time weight packing (hoisted out of the per-call path) -------------
def pack_decoder_params(params):
    H, E, V, L, K = HID_DIM, EMB_DIM, OUTPUT_DIM, N_LAYERS, KERNEL_SIZE
    v_pad = _round_up(max(V, LANE), LANE)

    # all three [32,32] projections stacked (relies on EMB_DIM == HID_DIM)
    proj_w = jnp.stack([params["w_e2h"], params["w_ah2e"], params["w_ae2h"]],
                       axis=0).astype(jnp.bfloat16)                    # [3, 32, 32]

    # conv weights: GLU value/gate split, then k-major stacking so rows match
    # the lane order of the [B*T, K*H] operand built in the kernel.
    cw = params["conv_w"]                                              # [L, K, H, 2H]
    cw_parts = jnp.stack([cw[..., :H], cw[..., H:]], axis=1)           # [L, 2, K, H, H]
    conv_w = cw_parts.reshape(L * 2, K * H, H).astype(jnp.bfloat16)    # [2L, K*H, H]

    # fused output projection: hid2emb followed by fc_out, padded to 128 lanes
    w_out = params["w_h2e"] @ params["w_fc"]                           # [H, V]
    b_out = params["b_h2e"] @ params["w_fc"] + params["b_fc"]          # [1, V]
    w_out = jnp.pad(w_out, ((0, 0), (0, v_pad - V))).astype(jnp.bfloat16)
    b_out = jnp.pad(b_out, ((0, 0), (0, v_pad - V)))

    def lane_row(b):
        b = b.reshape(1, -1)
        return jnp.pad(b, ((0, 0), (0, v_pad - b.shape[1])))

    cb = params["conv_b"].reshape(L, 2 * H)
    bias_rows = ([lane_row(params["b_e2h"]), lane_row(params["b_ah2e"]),
                  lane_row(params["b_ae2h"])]
                 + [lane_row(cb[l, :H]) for l in range(L)]             # conv value biases
                 + [lane_row(cb[l, H:]) for l in range(L)]             # conv gate biases
                 + [b_out])                                            # fused output bias
    bias_pack = jnp.concatenate(bias_rows, axis=0).astype(jnp.float32)  # [3+2L+1, v_pad]

    return {"proj_w": proj_w, "conv_w": conv_w, "bias": bias_pack, "w_out": w_out,
            "tok_emb": params["tok_emb"].astype(jnp.float32),
            "pos_emb": params["pos_emb"].astype(jnp.float32)}


# ---- one-time encoder-side prep (pad / transpose / bf16 / mask) --------------
def prepare_encoder(encoder_conved, encoder_combined, src_mask, trg_len):
    B, S, E = encoder_conved.shape
    s_pad = _round_up(max(S, LANE), LANE)

    encc = jnp.pad(encoder_conved.astype(jnp.float32),
                   ((0, 0), (0, s_pad - S), (0, 0)))                   # [B, s_pad, E]
    encz = jnp.pad(encoder_combined.astype(jnp.float32),
                   ((0, 0), (0, s_pad - S), (0, 0)))
    # keys for all batch elements lane-concatenated, values sublane-concatenated
    enck_all = jnp.transpose(encc, (2, 0, 1)).reshape(E, B * s_pad).astype(jnp.bfloat16)
    encz_all = encz.reshape(B * s_pad, E).astype(jnp.bfloat16)

    # block-diagonal additive mask: 0 where (own batch block AND unmasked src),
    # -1e10 everywhere else (other batch's block, lane padding, masked src).
    mask_f = jnp.pad(src_mask.astype(jnp.float32), ((0, 0), (0, s_pad - S)))   # [B, s_pad]
    eye = jnp.eye(B, dtype=jnp.float32)
    blk = (eye[:, :, None] * mask_f[None, :, :]).reshape(B, B * s_pad)          # [B, B*s_pad]
    add_mask = (blk - 1.0) * 1e10
    add_mask = jnp.broadcast_to(add_mask[:, None, :],
                                (B, trg_len, B * s_pad)).reshape(B * trg_len, B * s_pad)
    return enck_all, encz_all, add_mask


# ---- jitted per-call forward (embedding gather + one pallas_call) ------------
@functools.partial(jax.jit, static_argnames=("src_len",))
def decoder_forward(trg, enck_all, encz_all, add_mask, packed, *, src_len):
    B, T = trg.shape
    BT = B * T
    E = packed["tok_emb"].shape[1]
    v_pad = packed["w_out"].shape[-1]
    bs_pad = enck_all.shape[-1]
    s_pad = bs_pad // B

    # embedding gather + positional embedding (glue, plain JAX)
    pos = jnp.arange(T, dtype=jnp.int32)[None, :]
    embedded = (packed["tok_emb"][trg] + packed["pos_emb"][pos]).astype(jnp.float32)
    emb_flat = embedded.reshape(BT, E)

    def full_spec(shape):
        nd = len(shape)
        return pl.BlockSpec(shape, lambda i, _n=nd: (0,) * _n)

    args = (emb_flat, enck_all, encz_all, add_mask,
            packed["proj_w"], packed["conv_w"], packed["bias"], packed["w_out"])

    kernel = functools.partial(decoder_kernel,
                               n_layers=N_LAYERS, ksize=KERNEL_SIZE,
                               seq_len=T, pad_val=float(TRG_PAD_IDX))

    logits_pad, attn_pad = pl.pallas_call(
        kernel,
        out_shape=(jax.ShapeDtypeStruct((BT, v_pad), jnp.float32),
                   jax.ShapeDtypeStruct((BT, bs_pad), jnp.float32)),
        grid=(1,),
        in_specs=[full_spec(a.shape) for a in args],
        out_specs=(full_spec((BT, v_pad)), full_spec((BT, bs_pad))),
        compiler_params=pltpu.CompilerParams(
            dimension_semantics=("arbitrary",)),
    )(*args)

    logits = logits_pad.reshape(B, T, v_pad)[..., :OUTPUT_DIM]
    # pull the block-diagonal (each batch element attends only to its own src)
    attn4 = attn_pad.reshape(B, T, B, s_pad)
    attention = jnp.transpose(jnp.diagonal(attn4, axis1=0, axis2=2), (2, 0, 1))
    return logits, attention[..., :src_len]


# ---- pure-JAX reference (mirrors the PyTorch forward, eval mode) -------------
def reference_forward(trg, enc_conved, enc_combined, src_mask, params):
    B, T = trg.shape
    pos = jnp.arange(T, dtype=jnp.int32)[None, :]
    embedded = params["tok_emb"][trg] + params["pos_emb"][pos]
    conv_input = embedded @ params["w_e2h"] + params["b_e2h"]          # [B, T, H]
    mask = src_mask.astype(jnp.float32)
    attention = None
    for layer in range(N_LAYERS):
        pad = jnp.full((B, KERNEL_SIZE - 1, HID_DIM), float(TRG_PAD_IDX), jnp.float32)
        padded = jnp.concatenate([pad, conv_input], axis=1)
        conved2 = jnp.zeros((B, T, 2 * HID_DIM), jnp.float32)
        for k in range(KERNEL_SIZE):
            conved2 = conved2 + jnp.einsum("bth,ho->bto",
                                           padded[:, k:k + T, :],
                                           params["conv_w"][layer, k])
        conved2 = conved2 + params["conv_b"][layer]
        conved = conved2[..., :HID_DIM] * jax.nn.sigmoid(conved2[..., HID_DIM:])
        conved_emb = conved @ params["w_ah2e"] + params["b_ah2e"]
        combined = (conved_emb + embedded) * SCALE
        energy = jnp.einsum("bte,bse->bts", combined, enc_conved)
        energy = jnp.where(mask[:, None, :] == 0, -1e10, energy)
        attention = jax.nn.softmax(energy, axis=-1)
        attended = jnp.einsum("bts,bse->bte", attention, enc_combined)
        attended = attended @ params["w_ae2h"] + params["b_ae2h"]
        conved = (conved + attended) * SCALE
        conved = (conved + conv_input) * SCALE
        conv_input = conved
    conved_e = conv_input @ params["w_h2e"] + params["b_h2e"]
    output = conved_e @ params["w_fc"] + params["b_fc"]
    return output, attention


# ---- deterministic parameter init --------------------------------------------
def make_params(key):
    ks = jax.random.split(key, 16)
    n = lambda k, shape, s: jax.random.normal(k, shape, jnp.float32) * s
    return {
        "tok_emb": n(ks[0], (OUTPUT_DIM, EMB_DIM), 0.1),
        "pos_emb": n(ks[1], (MAX_LENGTH, EMB_DIM), 0.1),
        "w_e2h":   n(ks[2], (EMB_DIM, HID_DIM), 1.0 / math.sqrt(EMB_DIM)),
        "b_e2h":   n(ks[3], (1, HID_DIM), 0.01),
        "conv_w":  n(ks[4], (N_LAYERS, KERNEL_SIZE, HID_DIM, 2 * HID_DIM),
                     1.0 / math.sqrt(KERNEL_SIZE * HID_DIM)),
        "conv_b":  n(ks[5], (N_LAYERS, 1, 2 * HID_DIM), 0.01),
        "w_ah2e":  n(ks[6], (HID_DIM, EMB_DIM), 1.0 / math.sqrt(HID_DIM)),
        "b_ah2e":  n(ks[7], (1, EMB_DIM), 0.01),
        "w_ae2h":  n(ks[8], (EMB_DIM, HID_DIM), 1.0 / math.sqrt(EMB_DIM)),
        "b_ae2h":  n(ks[9], (1, HID_DIM), 0.01),
        "w_h2e":   n(ks[10], (HID_DIM, EMB_DIM), 1.0 / math.sqrt(HID_DIM)),
        "b_h2e":   n(ks[11], (1, EMB_DIM), 0.01),
        "w_fc":    n(ks[12], (EMB_DIM, OUTPUT_DIM), 1.0 / math.sqrt(EMB_DIM)),
        "b_fc":    n(ks[13], (1, OUTPUT_DIM), 0.01),
    }


if __name__ == "__main__":
    root = jax.random.PRNGKey(0)
    kp, kt, ke1, ke2 = jax.random.split(root, 4)

    params = make_params(kp)

    trg = jax.random.randint(kt, (BATCH, TRG_LEN), 0, OUTPUT_DIM, dtype=jnp.int32)
    encoder_conved = jax.random.normal(ke1, (BATCH, SRC_LEN, EMB_DIM), jnp.float32)
    encoder_combined = jax.random.normal(ke2, (BATCH, SRC_LEN, EMB_DIM), jnp.float32)
    src_mask = jnp.ones((BATCH, SRC_LEN), jnp.float32).at[1, -2:].set(0.0)

    # one-time prep, hoisted out of the per-call jitted path
    packed = pack_decoder_params(params)
    enck_all, encz_all, add_mask = prepare_encoder(encoder_conved, encoder_combined,
                                                   src_mask, TRG_LEN)

    out, attn = decoder_forward(trg, enck_all, encz_all, add_mask, packed,
                                src_len=SRC_LEN)
    out = jax.block_until_ready(out)
    attn = jax.block_until_ready(attn)

    assert out.shape == (BATCH, TRG_LEN, OUTPUT_DIM)
    assert attn.shape == (BATCH, TRG_LEN, SRC_LEN)

    ref_out, ref_attn = reference_forward(trg, encoder_conved, encoder_combined,
                                          src_mask, params)
    np.testing.assert_allclose(np.asarray(out), np.asarray(ref_out),
                               rtol=5e-2, atol=5e-2)
    np.testing.assert_allclose(np.asarray(attn), np.asarray(ref_attn),
                               rtol=5e-2, atol=5e-2)
    # attention rows sum to ~1 (exact softmax division in the kernel)
    np.testing.assert_allclose(np.asarray(attn).sum(-1),
                               np.ones((BATCH, TRG_LEN)), rtol=1e-2, atol=1e-2)

    print("KERNEL_OK")
</pallas_src>

<mosaic_0001>
module attributes {stable_mosaic.version = 11 : i64} {
  func.func @decoder_kernel(%arg0: i32, %arg1: memref<16x32xf32, #tpu.memory_space<vmem>>, %arg2: memref<32x256xbf16, #tpu.memory_space<vmem>>, %arg3: memref<256x32xbf16, #tpu.memory_space<vmem>>, %arg4: memref<16x256xf32, #tpu.memory_space<vmem>>, %arg5: memref<3x32x32xbf16, #tpu.memory_space<vmem>>, %arg6: memref<4x96x32xbf16, #tpu.memory_space<vmem>>, %arg7: memref<8x128xf32, #tpu.memory_space<vmem>>, %arg8: memref<32x128xbf16, #tpu.memory_space<vmem>>, %arg9: memref<16x128xf32, #tpu.memory_space<vmem>>, %arg10: memref<16x256xf32, #tpu.memory_space<vmem>>) attributes {dimension_semantics = [#tpu.dimension_semantics<arbitrary>], iteration_bounds = array<i64: 1>, scalar_prefetch = 0 : i64, scratch_operands = 0 : i64, tpu.core_type = #tpu.core_type<tc>, window_params = [{pipeline_mode = #tpu.pipeline_mode<synchronous>, transform_indices = @transform_0, window_bounds = array<i64: 16, 32>}, {pipeline_mode = #tpu.pipeline_mode<synchronous>, transform_indices = @transform_1, window_bounds = array<i64: 32, 256>}, {pipeline_mode = #tpu.pipeline_mode<synchronous>, transform_indices = @transform_2, window_bounds = array<i64: 256, 32>}, {pipeline_mode = #tpu.pipeline_mode<synchronous>, transform_indices = @transform_3, window_bounds = array<i64: 16, 256>}, {pipeline_mode = #tpu.pipeline_mode<synchronous>, transform_indices = @transform_4, window_bounds = array<i64: 3, 32, 32>}, {pipeline_mode = #tpu.pipeline_mode<synchronous>, transform_indices = @transform_5, window_bounds = array<i64: 4, 96, 32>}, {pipeline_mode = #tpu.pipeline_mode<synchronous>, transform_indices = @transform_6, window_bounds = array<i64: 8, 128>}, {pipeline_mode = #tpu.pipeline_mode<synchronous>, transform_indices = @transform_7, window_bounds = array<i64: 32, 128>}, {pipeline_mode = #tpu.pipeline_mode<synchronous>, transform_indices = @transform_8, window_bounds = array<i64: 16, 128>}, {pipeline_mode = #tpu.pipeline_mode<synchronous>, transform_indices = @transform_9, window_bounds = array<i64: 16, 256>}]} {
    %c0 = arith.constant 0 : index
    %c0_0 = arith.constant 0 : index
    %0 = vector.load %arg1[%c0, %c0_0] : memref<16x32xf32, #tpu.memory_space<vmem>>, vector<16x32xf32>
    %c0_1 = arith.constant 0 : index
    %c0_2 = arith.constant 0 : index
    %1 = vector.load %arg2[%c0_1, %c0_2] : memref<32x256xbf16, #tpu.memory_space<vmem>>, vector<32x256xbf16>
    %c0_3 = arith.constant 0 : index
    %c0_4 = arith.constant 0 : index
    %2 = vector.load %arg3[%c0_3, %c0_4] : memref<256x32xbf16, #tpu.memory_space<vmem>>, vector<256x32xbf16>
    %c0_5 = arith.constant 0 : index
    %c0_6 = arith.constant 0 : index
    %3 = vector.load %arg4[%c0_5, %c0_6] : memref<16x256xf32, #tpu.memory_space<vmem>>, vector<16x256xf32>
    %c0_7 = arith.constant 0 : index
    %c0_8 = arith.constant 0 : index
    %4 = vector.load %arg7[%c0_7, %c0_8] : memref<8x128xf32, #tpu.memory_space<vmem>>, vector<8x128xf32>
    %c0_9 = arith.constant 0 : index
    %c0_10 = arith.constant 0 : index
    %5 = vector.load %arg8[%c0_9, %c0_10] : memref<32x128xbf16, #tpu.memory_space<vmem>>, vector<32x128xbf16>
    %6 = vector.extract_strided_slice %4 {offsets = [0, 0], sizes = [1, 32], strides = [1, 1]} : vector<8x128xf32> to vector<1x32xf32>
    %7 = vector.extract_strided_slice %4 {offsets = [1, 0], sizes = [1, 32], strides = [1, 1]} : vector<8x128xf32> to vector<1x32xf32>
    %8 = vector.extract_strided_slice %4 {offsets = [2, 0], sizes = [1, 32], strides = [1, 1]} : vector<8x128xf32> to vector<1x32xf32>
    %9 = vector.extract_strided_slice %4 {offsets = [7, 0], sizes = [1, 128], strides = [1, 1]} : vector<8x128xf32> to vector<1x128xf32>
    %c0_11 = arith.constant 0 : index
    %c0_12 = arith.constant 0 : index
    %c0_13 = arith.constant 0 : index
    %10 = vector.load %arg5[%c0_11, %c0_12, %c0_13] : memref<3x32x32xbf16, #tpu.memory_space<vmem>>, vector<1x32x32xbf16>
    %11 = vector.shape_cast %10 : vector<1x32x32xbf16> to vector<32x32xbf16>
    %12 = arith.truncf %0 : vector<16x32xf32> to vector<16x32xbf16>
    %cst = arith.constant dense<0.000000e+00> : vector<16x32xf32>
    %13 = tpu.matmul %12, %11, %cst {dimension_numbers = #tpu.dot_dimension_numbers<[1], [0], [0], [1], [0, 0, 1, 1], [], []>} : vector<16x32xbf16>, vector<32x32xbf16>, vector<16x32xf32> -> vector<16x32xf32>
    %14 = vector.broadcast %6 : vector<1x32xf32> to vector<16x32xf32>
    %15 = arith.addf %13, %14 : vector<16x32xf32>
    %16 = tpu.iota {dimensions = array<i32: 0>} : vector<16x32xi32>
    %c7_i32 = arith.constant 7 : i32
    %17 = vector.broadcast %c7_i32 : i32 to vector<16x32xi32>
    %18 = arith.andi %16, %17 : vector<16x32xi32>
    %c2_i32 = arith.constant 2 : i32
    %19 = tpu.dynamic_rotate %15 by %c2_i32 dim 0 : vector<16x32xf32>, i32 -> vector<16x32xf32>
    %c2_i32_14 = arith.constant 2 : i32
    %20 = vector.broadcast %c2_i32_14 : i32 to vector<16x32xi32>
    %21 = arith.cmpi slt, %18, %20 : vector<16x32xi32>
    %cst_15 = arith.constant 1.000000e+00 : f32
    %22 = vector.broadcast %cst_15 : f32 to vector<16x32xf32>
    %23 = arith.select %21, %22, %19 : vector<16x32xi1>, vector<16x32xf32>
    %c1_i32 = arith.constant 1 : i32
    %24 = tpu.dynamic_rotate %15 by %c1_i32 dim 0 : vector<16x32xf32>, i32 -> vector<16x32xf32>
    %c1_i32_16 = arith.constant 1 : i32
    %25 = vector.broadcast %c1_i32_16 : i32 to vector<16x32xi32>
    %26 = arith.cmpi slt, %18, %25 : vector<16x32xi32>
    %cst_17 = arith.constant 1.000000e+00 : f32
    %27 = vector.broadcast %cst_17 : f32 to vector<16x32xf32>
    %28 = arith.select %26, %27, %24 : vector<16x32xi1>, vector<16x32xf32>
    %29 = tpu.concatenate %23, %28, %15 in 1 : vector<16x32xf32>, vector<16x32xf32>, vector<16x32xf32> -> vector<16x96xf32>
    %30 = arith.truncf %29 : vector<16x96xf32> to vector<16x96xbf16>
    %c0_18 = arith.constant 0 : index
    %c0_19 = arith.constant 0 : index
    %c0_20 = arith.constant 0 : index
    %31 = vector.load %arg6[%c0_18, %c0_19, %c0_20] : memref<4x96x32xbf16, #tpu.memory_space<vmem>>, vector<1x96x32xbf16>
    %32 = vector.shape_cast %31 : vector<1x96x32xbf16> to vector<96x32xbf16>
    %cst_21 = arith.constant dense<0.000000e+00> : vector<16x32xf32>
    %33 = tpu.matmul %30, %32, %cst_21 {dimension_numbers = #tpu.dot_dimension_numbers<[1], [0], [0], [1], [0, 0, 1, 1], [], []>} : vector<16x96xbf16>, vector<96x32xbf16>, vector<16x32xf32> -> vector<16x32xf32>
    %34 = vector.extract_strided_slice %4 {offsets = [3, 0], sizes = [1, 32], strides = [1, 1]} : vector<8x128xf32> to vector<1x32xf32>
    %35 = vector.broadcast %34 : vector<1x32xf32> to vector<16x32xf32>
    %36 = arith.addf %33, %35 : vector<16x32xf32>
    %c1 = arith.constant 1 : index
    %c0_22 = arith.constant 0 : index
    %c0_23 = arith.constant 0 : index
    %37 = vector.load %arg6[%c1, %c0_22, %c0_23] : memref<4x96x32xbf16, #tpu.memory_space<vmem>>, vector<1x96x32xbf16>
    %38 = vector.shape_cast %37 : vector<1x96x32xbf16> to vector<96x32xbf16>
    %cst_24 = arith.constant dense<0.000000e+00> : vector<16x32xf32>
    %39 = tpu.matmul %30, %38, %cst_24 {dimension_numbers = #tpu.dot_dimension_numbers<[1], [0], [0], [1], [0, 0, 1, 1], [], []>} : vector<16x96xbf16>, vector<96x32xbf16>, vector<16x32xf32> -> vector<16x32xf32>
    %40 = vector.extract_strided_slice %4 {offsets = [5, 0], sizes = [1, 32], strides = [1, 1]} : vector<8x128xf32> to vector<1x32xf32>
    %41 = vector.broadcast %40 : vector<1x32xf32> to vector<16x32xf32>
    %42 = arith.addf %39, %41 : vector<16x32xf32>
    %43 = arith.negf %42 : vector<16x32xf32>
    %44 = math.exp %43 : vector<16x32xf32>
    %cst_25 = arith.constant 1.000000e+00 : f32
    %45 = vector.broadcast %cst_25 : f32 to vector<16x32xf32>
    %46 = arith.addf %45, %44 : vector<16x32xf32>
    %47 = arith.divf %45, %46 : vector<16x32xf32>
    %48 = arith.mulf %36, %47 : vector<16x32xf32>
    %c1_26 = arith.constant 1 : index
    %c0_27 = arith.constant 0 : index
    %c0_28 = arith.constant 0 : index
    %49 = vector.load %arg5[%c1_26, %c0_27, %c0_28] : memref<3x32x32xbf16, #tpu.memory_space<vmem>>, vector<1x32x32xbf16>
    %50 = vector.shape_cast %49 : vector<1x32x32xbf16> to vector<32x32xbf16>
    %51 = arith.truncf %48 : vector<16x32xf32> to vector<16x32xbf16>
    %cst_29 = arith.constant dense<0.000000e+00> : vector<16x32xf32>
    %52 = tpu.matmul %51, %50, %cst_29 {dimension_numbers = #tpu.dot_dimension_numbers<[1], [0], [0], [1], [0, 0, 1, 1], [], []>} : vector<16x32xbf16>, vector<32x32xbf16>, vector<16x32xf32> -> vector<16x32xf32>
    %53 = vector.broadcast %7 : vector<1x32xf32> to vector<16x32xf32>
    %54 = arith.addf %52, %53 : vector<16x32xf32>
    %55 = arith.addf %54, %0 : vector<16x32xf32>
    %cst_30 = arith.constant 0.707106769 : f32
    %56 = vector.broadcast %cst_30 : f32 to vector<16x32xf32>
    %57 = arith.mulf %55, %56 : vector<16x32xf32>
    %58 = arith.truncf %57 : vector<16x32xf32> to vector<16x32xbf16>
    %cst_31 = arith.constant dense<0.000000e+00> : vector<16x256xf32>
    %59 = tpu.matmul %58, %1, %cst_31 {dimension_numbers = #tpu.dot_dimension_numbers<[1], [0], [0], [1], [0, 0, 1, 1], [], []>} : vector<16x32xbf16>, vector<32x256xbf16>, vector<16x256xf32> -> vector<16x256xf32>
    %60 = arith.addf %59, %3 : vector<16x256xf32>
    %cst_32 = arith.constant dense<0xFF800000> : vector<16xf32>
    %61 = vector.multi_reduction <maximumf>, %60, %cst_32 [1] : vector<16x256xf32> to vector<16xf32>
    %62 = vector.shape_cast %61 : vector<16xf32> to vector<16x1xf32>
    %63 = vector.broadcast %62 : vector<16x1xf32> to vector<16x256xf32>
    %64 = arith.subf %60, %63 : vector<16x256xf32>
    %65 = math.exp %64 : vector<16x256xf32>
    %cst_33 = arith.constant dense<0.000000e+00> : vector<16xf32>
    %66 = vector.multi_reduction <add>, %65, %cst_33 [1] : vector<16x256xf32> to vector<16xf32>
    %67 = vector.shape_cast %66 : vector<16xf32> to vector<16x1xf32>
    %68 = vector.broadcast %67 : vector<16x1xf32> to vector<16x256xf32>
    %69 = arith.divf %65, %68 : vector<16x256xf32>
    %70 = arith.truncf %69 : vector<16x256xf32> to vector<16x256xbf16>
    %cst_34 = arith.constant dense<0.000000e+00> : vector<16x32xf32>
    %71 = tpu.matmul %70, %2, %cst_34 {dimension_numbers = #tpu.dot_dimension_numbers<[1], [0], [0], [1], [0, 0, 1, 1], [], []>} : vector<16x256xbf16>, vector<256x32xbf16>, vector<16x32xf32> -> vector<16x32xf32>
    %c2 = arith.constant 2 : index
    %c0_35 = arith.constant 0 : index
    %c0_36 = arith.constant 0 : index
    %72 = vector.load %arg5[%c2, %c0_35, %c0_36] : memref<3x32x32xbf16, #tpu.memory_space<vmem>>, vector<1x32x32xbf16>
    %73 = vector.shape_cast %72 : vector<1x32x32xbf16> to vector<32x32xbf16>
    %74 = arith.truncf %71 : vector<16x32xf32> to vector<16x32xbf16>
    %cst_37 = arith.constant dense<0.000000e+00> : vector<16x32xf32>
    %75 = tpu.matmul %74, %73, %cst_37 {dimension_numbers = #tpu.dot_dimension_numbers<[1], [0], [0], [1], [0, 0, 1, 1], [], []>} : vector<16x32xbf16>, vector<32x32xbf16>, vector<16x32xf32> -> vector<16x32xf32>
    %76 = vector.broadcast %8 : vector<1x32xf32> to vector<16x32xf32>
    %77 = arith.addf %75, %76 : vector<16x32xf32>
    %78 = arith.addf %48, %77 : vector<16x32xf32>
    %cst_38 = arith.constant 0.707106769 : f32
    %79 = vector.broadcast %cst_38 : f32 to vector<16x32xf32>
    %80 = arith.mulf %78, %79 : vector<16x32xf32>
    %81 = arith.addf %80, %15 : vector<16x32xf32>
    %cst_39 = arith.constant 0.707106769 : f32
    %82 = vector.broadcast %cst_39 : f32 to vector<16x32xf32>
    %83 = arith.mulf %81, %82 : vector<16x32xf32>
    %c2_i32_40 = arith.constant 2 : i32
    %84 = tpu.dynamic_rotate %83 by %c2_i32_40 dim 0 : vector<16x32xf32>, i32 -> vector<16x32xf32>
    %c2_i32_41 = arith.constant 2 : i32
    %85 = vector.broadcast %c2_i32_41 : i32 to vector<16x32xi32>
    %86 = arith.cmpi slt, %18, %85 : vector<16x32xi32>
    %cst_42 = arith.constant 1.000000e+00 : f32
    %87 = vector.broadcast %cst_42 : f32 to vector<16x32xf32>
    %88 = arith.select %86, %87, %84 : vector<16x32xi1>, vector<16x32xf32>
    %c1_i32_43 = arith.constant 1 : i32
    %89 = tpu.dynamic_rotate %83 by %c1_i32_43 dim 0 : vector<16x32xf32>, i32 -> vector<16x32xf32>
    %c1_i32_44 = arith.constant 1 : i32
    %90 = vector.broadcast %c1_i32_44 : i32 to vector<16x32xi32>
    %91 = arith.cmpi slt, %18, %90 : vector<16x32xi32>
    %cst_45 = arith.constant 1.000000e+00 : f32
    %92 = vector.broadcast %cst_45 : f32 to vector<16x32xf32>
    %93 = arith.select %91, %92, %89 : vector<16x32xi1>, vector<16x32xf32>
    %94 = tpu.concatenate %88, %93, %83 in 1 : vector<16x32xf32>, vector<16x32xf32>, vector<16x32xf32> -> vector<16x96xf32>
    %95 = arith.truncf %94 : vector<16x96xf32> to vector<16x96xbf16>
    %c2_46 = arith.constant 2 : index
    %c0_47 = arith.constant 0 : index
    %c0_48 = arith.constant 0 : index
    %96 = vector.load %arg6[%c2_46, %c0_47, %c0_48] : memref<4x96x32xbf16, #tpu.memory_space<vmem>>, vector<1x96x32xbf16>
    %97 = vector.shape_cast %96 : vector<1x96x32xbf16> to vector<96x32xbf16>
    %cst_49 = arith.constant dense<0.000000e+00> : vector<16x32xf32>
    %98 = tpu.matmul %95, %97, %cst_49 {dimension_numbers = #tpu.dot_dimension_numbers<[1], [0], [0], [1], [0, 0, 1, 1], [], []>} : vector<16x96xbf16>, vector<96x32xbf16>, vector<16x32xf32> -> vector<16x32xf32>
    %99 = vector.extract_strided_slice %4 {offsets = [4, 0], sizes = [1, 32], strides = [1, 1]} : vector<8x128xf32> to vector<1x32xf32>
    %100 = vector.broadcast %99 : vector<1x32xf32> to vector<16x32xf32>
    %101 = arith.addf %98, %100 : vector<16x32xf32>
    %c3 = arith.constant 3 : index
    %c0_50 = arith.constant 0 : index
    %c0_51 = arith.constant 0 : index
    %102 = vector.load %arg6[%c3, %c0_50, %c0_51] : memref<4x96x32xbf16, #tpu.memory_space<vmem>>, vector<1x96x32xbf16>
    %103 = vector.shape_cast %102 : vector<1x96x32xbf16> to vector<96x32xbf16>
    %cst_52 = arith.constant dense<0.000000e+00> : vector<16x32xf32>
    %104 = tpu.matmul %95, %103, %cst_52 {dimension_numbers = #tpu.dot_dimension_numbers<[1], [0], [0], [1], [0, 0, 1, 1], [], []>} : vector<16x96xbf16>, vector<96x32xbf16>, vector<16x32xf32> -> vector<16x32xf32>
    %105 = vector.extract_strided_slice %4 {offsets = [6, 0], sizes = [1, 32], strides = [1, 1]} : vector<8x128xf32> to vector<1x32xf32>
    %106 = vector.broadcast %105 : vector<1x32xf32> to vector<16x32xf32>
    %107 = arith.addf %104, %106 : vector<16x32xf32>
    %108 = arith.negf %107 : vector<16x32xf32>
    %109 = math.exp %108 : vector<16x32xf32>
    %cst_53 = arith.constant 1.000000e+00 : f32
    %110 = vector.broadcast %cst_53 : f32 to vector<16x32xf32>
    %111 = arith.addf %110, %109 : vector<16x32xf32>
    %112 = arith.divf %110, %111 : vector<16x32xf32>
    %113 = arith.mulf %101, %112 : vector<16x32xf32>
    %c1_54 = arith.constant 1 : index
    %c0_55 = arith.constant 0 : index
    %c0_56 = arith.constant 0 : index
    %114 = vector.load %arg5[%c1_54, %c0_55, %c0_56] : memref<3x32x32xbf16, #tpu.memory_space<vmem>>, vector<1x32x32xbf16>
    %115 = vector.shape_cast %114 : vector<1x32x32xbf16> to vector<32x32xbf16>
    %116 = arith.truncf %113 : vector<16x32xf32> to vector<16x32xbf16>
    %cst_57 = arith.constant dense<0.000000e+00> : vector<16x32xf32>
    %117 = tpu.matmul %116, %115, %cst_57 {dimension_numbers = #tpu.dot_dimension_numbers<[1], [0], [0], [1], [0, 0, 1, 1], [], []>} : vector<16x32xbf16>, vector<32x32xbf16>, vector<16x32xf32> -> vector<16x32xf32>
    %118 = vector.broadcast %7 : vector<1x32xf32> to vector<16x32xf32>
    %119 = arith.addf %117, %118 : vector<16x32xf32>
    %120 = arith.addf %119, %0 : vector<16x32xf32>
    %cst_58 = arith.constant 0.707106769 : f32
    %121 = vector.broadcast %cst_58 : f32 to vector<16x32xf32>
    %122 = arith.mulf %120, %121 : vector<16x32xf32>
    %123 = arith.truncf %122 : vector<16x32xf32> to vector<16x32xbf16>
    %cst_59 = arith.constant dense<0.000000e+00> : vector<16x256xf32>
    %124 = tpu.matmul %123, %1, %cst_59 {dimension_numbers = #tpu.dot_dimension_numbers<[1], [0], [0], [1], [0, 0, 1, 1], [], []>} : vector<16x32xbf16>, vector<32x256xbf16>, vector<16x256xf32> -> vector<16x256xf32>
    %125 = arith.addf %124, %3 : vector<16x256xf32>
    %cst_60 = arith.constant dense<0xFF800000> : vector<16xf32>
    %126 = vector.multi_reduction <maximumf>, %125, %cst_60 [1] : vector<16x256xf32> to vector<16xf32>
    %127 = vector.shape_cast %126 : vector<16xf32> to vector<16x1xf32>
    %128 = vector.broadcast %127 : vector<16x1xf32> to vector<16x256xf32>
    %129 = arith.subf %125, %128 : vector<16x256xf32>
    %130 = math.exp %129 : vector<16x256xf32>
    %cst_61 = arith.constant dense<0.000000e+00> : vector<16xf32>
    %131 = vector.multi_reduction <add>, %130, %cst_61 [1] : vector<16x256xf32> to vector<16xf32>
    %132 = vector.shape_cast %131 : vector<16xf32> to vector<16x1xf32>
    %133 = vector.broadcast %132 : vector<16x1xf32> to vector<16x256xf32>
    %134 = arith.divf %130, %133 : vector<16x256xf32>
    %135 = arith.truncf %134 : vector<16x256xf32> to vector<16x256xbf16>
    %cst_62 = arith.constant dense<0.000000e+00> : vector<16x32xf32>
    %136 = tpu.matmul %135, %2, %cst_62 {dimension_numbers = #tpu.dot_dimension_numbers<[1], [0], [0], [1], [0, 0, 1, 1], [], []>} : vector<16x256xbf16>, vector<256x32xbf16>, vector<16x32xf32> -> vector<16x32xf32>
    %c2_63 = arith.constant 2 : index
    %c0_64 = arith.constant 0 : index
    %c0_65 = arith.constant 0 : index
    %137 = vector.load %arg5[%c2_63, %c0_64, %c0_65] : memref<3x32x32xbf16, #tpu.memory_space<vmem>>, vector<1x32x32xbf16>
    %138 = vector.shape_cast %137 : vector<1x32x32xbf16> to vector<32x32xbf16>
    %139 = arith.truncf %136 : vector<16x32xf32> to vector<16x32xbf16>
    %cst_66 = arith.constant dense<0.000000e+00> : vector<16x32xf32>
    %140 = tpu.matmul %139, %138, %cst_66 {dimension_numbers = #tpu.dot_dimension_numbers<[1], [0], [0], [1], [0, 0, 1, 1], [], []>} : vector<16x32xbf16>, vector<32x32xbf16>, vector<16x32xf32> -> vector<16x32xf32>
    %141 = vector.broadcast %8 : vector<1x32xf32> to vector<16x32xf32>
    %142 = arith.addf %140, %141 : vector<16x32xf32>
    %143 = arith.addf %113, %142 : vector<16x32xf32>
    %cst_67 = arith.constant 0.707106769 : f32
    %144 = vector.broadcast %cst_67 : f32 to vector<16x32xf32>
    %145 = arith.mulf %143, %144 : vector<16x32xf32>
    %146 = arith.addf %145, %83 : vector<16x32xf32>
    %cst_68 = arith.constant 0.707106769 : f32
    %147 = vector.broadcast %cst_68 : f32 to vector<16x32xf32>
    %148 = arith.mulf %146, %147 : vector<16x32xf32>
    %149 = arith.truncf %148 : vector<16x32xf32> to vector<16x32xbf16>
    %cst_69 = arith.constant dense<0.000000e+00> : vector<16x128xf32>
    %150 = tpu.matmul %149, %5, %cst_69 {dimension_numbers = #tpu.dot_dimension_numbers<[1], [0], [0], [1], [0, 0, 1, 1], [], []>} : vector<16x32xbf16>, vector<32x128xbf16>, vector<16x128xf32> -> vector<16x128xf32>
    %151 = vector.broadcast %9 : vector<1x128xf32> to vector<16x128xf32>
    %152 = arith.addf %150, %151 : vector<16x128xf32>
    %c0_70 = arith.constant 0 : index
    %c0_71 = arith.constant 0 : index
    %153 = vector.load %arg9[%c0_70, %c0_71] : memref<16x128xf32, #tpu.memory_space<vmem>>, vector<16x128xf32>
    tpu.vector_store %arg9[%c0_70, %c0_71], %152 {strides = array<i32>} : memref<16x128xf32, #tpu.memory_space<vmem>>, vector<16x128xf32>,
    %c0_72 = arith.constant 0 : index
    %c0_73 = arith.constant 0 : index
    %154 = vector.load %arg10[%c0_72, %c0_73] : memref<16x256xf32, #tpu.memory_space<vmem>>, vector<16x256xf32>
    tpu.vector_store %arg10[%c0_72, %c0_73], %134 {strides = array<i32>} : memref<16x256xf32, #tpu.memory_space<vmem>>, vector<16x256xf32>,
    return
  }
  func.func @transform_0(%arg0: i32) -> (i32, i32) {
    %c0_i32 = arith.constant 0 : i32
    %c0_i32_0 = arith.constant 0 : i32
    %c0_i32_1 = arith.constant 0 : i32
    return %c0_i32, %c0_i32_0 : i32, i32
  }
  func.func @transform_1(%arg0: i32) -> (i32, i32) {
    %c0_i32 = arith.constant 0 : i32
    %c0_i32_0 = arith.constant 0 : i32
    %c0_i32_1 = arith.constant 0 : i32
    return %c0_i32, %c0_i32_0 : i32, i32
  }
  func.func @transform_2(%arg0: i32) -> (i32, i32) {
    %c0_i32 = arith.constant 0 : i32
    %c0_i32_0 = arith.constant 0 : i32
    %c0_i32_1 = arith.constant 0 : i32
    return %c0_i32, %c0_i32_0 : i32, i32
  }
  func.func @transform_3(%arg0: i32) -> (i32, i32) {
    %c0_i32 = arith.constant 0 : i32
    %c0_i32_0 = arith.constant 0 : i32
    %c0_i32_1 = arith.constant 0 : i32
    return %c0_i32, %c0_i32_0 : i32, i32
  }
  func.func @transform_4(%arg0: i32) -> (i32, i32, i32) {
    %c0_i32 = arith.constant 0 : i32
    %c0_i32_0 = arith.constant 0 : i32
    %c0_i32_1 = arith.constant 0 : i32
    %c0_i32_2 = arith.constant 0 : i32
    return %c0_i32, %c0_i32_0, %c0_i32_1 : i32, i32, i32
  }
  func.func @transform_5(%arg0: i32) -> (i32, i32, i32) {
    %c0_i32 = arith.constant 0 : i32
    %c0_i32_0 = arith.constant 0 : i32
    %c0_i32_1 = arith.constant 0 : i32
    %c0_i32_2 = arith.constant 0 : i32
    return %c0_i32, %c0_i32_0, %c0_i32_1 : i32, i32, i32
  }
  func.func @transform_6(%arg0: i32) -> (i32, i32) {
    %c0_i32 = arith.constant 0 : i32
    %c0_i32_0 = arith.constant 0 : i32
    %c0_i32_1 = arith.constant 0 : i32
    return %c0_i32, %c0_i32_0 : i32, i32
  }
  func.func @transform_7(%arg0: i32) -> (i32, i32) {
    %c0_i32 = arith.constant 0 : i32
    %c0_i32_0 = arith.constant 0 : i32
    %c0_i32_1 = arith.constant 0 : i32
    return %c0_i32, %c0_i32_0 : i32, i32
  }
  func.func @transform_8(%arg0: i32) -> (i32, i32) {
    %c0_i32 = arith.constant 0 : i32
    %c0_i32_0 = arith.constant 0 : i32
    %c0_i32_1 = arith.constant 0 : i32
    return %c0_i32, %c0_i32_0 : i32, i32
  }
  func.func @transform_9(%arg0: i32) -> (i32, i32) {
    %c0_i32 = arith.constant 0 : i32
    %c0_i32_0 = arith.constant 0 : i32
    %c0_i32_1 = arith.constant 0 : i32
    return %c0_i32, %c0_i32_0 : i32, i32
  }
}

</mosaic_0001>

<bundles_post_ra>
// kernel: decoder_forward.1
= control target key start
LH: loop header
LB: loop body
LE: loop exit
PB: predicated region body
PF: predicated region fallthrough
CT: control target
= control target key end

     0   :  { %v1783_v1 = vmov 0.0   ;;  %vm1784_vm0 = vmmov 0   ;;  %vm101_vm1 = vcmask 261120   ;;  %s2370_s0 = inlined_call_operand.vmem [shape: f32[16,32], index: 0, kind: input, shape index: {}]   ;;  %s2371_s1 = inlined_call_operand.vmem [shape: bf16[32,256], index: 1, kind: input, shape index: {}]   ;;  %s2372_s2 = inlined_call_operand.vmem [shape: bf16[256,32], index: 2, kind: input, shape index: {}]   ;;  %s2373_s3 = inlined_call_operand.vmem [shape: f32[16,256], index: 3, kind: input, shape index: {}]   ;;  %s2374_s4 = inlined_call_operand.vmem [shape: bf16[3,32,32], index: 4, kind: input, shape index: {}]   ;;  %s2375_s5 = inlined_call_operand.vmem [shape: bf16[4,96,32], index: 5, kind: input, shape index: {}]   ;;  %s2376_s6 = inlined_call_operand.vmem [shape: f32[8,128], index: 6, kind: input, shape index: {}]   ;;  %s2377_s7 = inlined_call_operand.vmem [shape: bf16[32,128], index: 7, kind: input, shape index: {}]   ;;  %s2378_s8 = inlined_call_operand.hbm [shape: f32[16,128], index: 8, kind: output, shape index: {0}]   ;;  %s2379_s9 = inlined_call_operand.vmem [shape: f32[16,256], index: 9, kind: output, shape index: {1}]  }
   0x1   :  { %v1665_v0 = vld [vmem:[%s2374_s4] sm:$0xff]   ;;  %1525 = vmatprep.subr.bf16.mxu1 %v1783_v1  ;;  %1549 = vmatprep.subr.bf16.mxu0 %v1783_v1  ;;  %v1666_v2 = vld [vmem:[%s2374_s4 + $0x8] sm:$0xff]  }
   0x2   :  { %1526 = vmatpush3.bf16.msra.mxu1 %v1665_v0  ;;  %1529 = vmatprep.mubr.msk.bf16.mxu1 %vm1784_vm0, %v1783_v1  ;;  %v1854_v3 = vld [vmem:[%s2370_s0] sm:$0xff]  ;;  %v1859_v4 = vld [vmem:[%s2370_s0 + $0x8] sm:$0xff] }
   0x3   :  { %1527 = vmatprep.subr.bf16.mxu1 %v1783_v1  ;;  %1561 = vmatprep.mubr.msk.bf16.mxu0 %vm1784_vm0, %v1783_v1  ;;  %v84_v5 = vpack.c.bf16 %v1859_v4, %v1854_v3 }
   0x6   :  { %1528 = vmatpush3.bf16.msra.mxu1 %v1666_v2 }
   0x7   :  { %1533 = vmatprep.subr.bf16.mxu1 %v1783_v1 }
   0x9   :  { %1530 = vmatmul.mubr.msk.bf16.vlgmr.msra.gmra.mrb[0].mxu1 %vm101_vm1, %v84_v5 }
   0xa   :  { %1545 = vmatprep.mubr.msk.bf16.mxu1 %vm1784_vm0, %v1783_v1 }
   0xb   :  { %15 = vsyncpa [#allocation3], 0  ;;  %v1667_v6 = vld [vmem:[%s2375_s5] sm:$0xff]   ;;  %v1668_v7 = vld [vmem:[%s2375_s5 + $0x30] sm:$0xff]   ;;  %v85_v14 = vlaneseq  ;;  %s1785_s19 = smov 32   ;;  %s1786_s20 = smov 64  }
   0xc   :  { %1534 = vmatpush3.bf16.msra.mxu1 %v1667_v6  ;;  %1550 = vmatpush3.bf16.msra.mxu0 %v1668_v7  ;;  %v1669_v8 = vld [vmem:[%s2375_s5 + $0x8] sm:$0xff]   ;;  %v1670_v9 = vld [vmem:[%s2375_s5 + $0x38] sm:$0xff]   ;;  %v1671_v10 = vld [vmem:[%s2375_s5 + $0x10] sm:$0xff]   ;;  %vm187_vm8 = vcmask 523264   ;;  %vm243_vm9 = vcmask 785408  }
   0xd   :  { %1535 = vmatprep.subr.bf16.mxu1 %v1783_v1  ;;  %1551 = vmatprep.subr.bf16.mxu0 %v1783_v1  ;;  %v1672_v11 = vld [vmem:[%s2375_s5 + $0x40] sm:$0xff]   ;;  %v1673_v12 = vld [vmem:[%s2375_s5 + $0x18] sm:$0xff]   ;;  %v1674_v13 = vld [vmem:[%s2375_s5 + $0x48] sm:$0xff]   ;;  %v1902_v15 = vshrl.u32 %v85_v14, 7 }
   0xe   :  { %v1908_v17 = vld [vmem:[%s2376_s6] sm:$0xff]  ;;  %v1676_v21 = vld [vmem:[%s2375_s5 + $0x50] sm:$0xff]   ;;  %v1677_v28 = vld [vmem:[%s2375_s5 + $0x28] sm:$0xff]  }
   0xf   :  { %v87_v16 = vsub.s32 0, %v1902_v15  ;;  %v148_v19 = vadd.s32 8, %v1902_v15  ;;  %v1675_v20 = vld [vmem:[%s2375_s5 + $0x20] sm:$0xff]   ;;  %v149_v25 = vand.u32 7, %v1902_v15  ;;  %v1678_v29 = vld [vmem:[%s2375_s5 + $0x58] sm:$0xff]   ;;  %vm162_vm2 = vcmp.lt.s32.totalorder %v1902_v15, 1 }
  0x10   :  { %1536 = vmatpush3.bf16.msra.mxu1 %v1669_v8  ;;  %1552 = vmatpush3.bf16.msra.mxu0 %v1670_v9  ;;  %vm153_vm5 = vcmp.lt.s32.totalorder %v1902_v15, 2  ;;  %v1985_v61 = vld [vmem:[%s2374_s4 + $0x10] sm:$0xff]   ;;  %v1991_v62 = vld [vmem:[%s2374_s4 + $0x18] sm:$0xff]   ;;  %v303_v63 = vsub.s32 5, %v1902_v15  ;;  %v921_v45 = vsub.s32 6, %v1902_v15 }
  0x11   :  { %1537 = vmatprep.subr.bf16.mxu1 %v1783_v1  ;;  %1553 = vmatprep.subr.bf16.mxu0 %v1783_v1  ;;  %v88_v18 = vrot.slane %v1908_v17, %v87_v16  ;;  %v150_v26 = vand.u32 7, %v148_v19  ;;  %vm1934_vm3 = vcmp.lt.s32.totalorder %v149_v25, 1  ;;  %vm1958_vm6 = vcmp.lt.s32.totalorder %v149_v25, 2 }
  0x12   :  { %v304_v0 = vrot.slane %v1908_v17, %v303_v63  ;;  %v2062_v63 = vld [vmem:[%s2373_s3 + $0x18] sm:$0xff]  ;;  %v922_v46 = vrot.slane %v1908_v17, %v921_v45 }
  0x13   :  { %vm1938_vm4 = vcmp.lt.s32.totalorder %v150_v26, 1  ;;  %vm1962_vm7 = vcmp.lt.s32.totalorder %v150_v26, 2 }
  0x14   :  { %1538 = vmatpush3.bf16.msra.mxu1 %v1671_v10  ;;  %1554 = vmatpush3.bf16.msra.mxu0 %v1672_v11 }
  0x15   :  { %1539 = vmatprep.subr.bf16.mxu1 %v1783_v1  ;;  %1555 = vmatprep.subr.bf16.mxu0 %v1783_v1 }
  0x18   :  { %1540 = vmatpush3.bf16.msra.mxu1 %v1673_v12  ;;  %1556 = vmatpush3.bf16.msra.mxu0 %v1674_v13 }
  0x19   :  { %1541 = vmatprep.subr.bf16.mxu1 %v1783_v1  ;;  %1557 = vmatprep.subr.bf16.mxu0 %v1783_v1 }
  0x1c   :  { %1542 = vmatpush3.bf16.msra.mxu1 %v1675_v20  ;;  %1558 = vmatpush3.bf16.msra.mxu0 %v1676_v21 }
  0x1d   :  { %1543 = vmatprep.subr.bf16.mxu1 %v1783_v1  ;;  %1559 = vmatprep.subr.bf16.mxu0 %v1783_v1 }
  0x20   :  { %1544 = vmatpush3.bf16.msra.mxu1 %v1677_v28  ;;  %1560 = vmatpush3.bf16.msra.mxu0 %v1678_v29 }
  0x21   :  { %1565 = vmatprep.subr.bf16.mxu1 %v1783_v1 }
  0xdc   :  { %v139_v22 = vpop.f32.mrb[0].mxu1 }
  0xdd   :  { %v1918_v23 = vadd.f32 %v139_v22, %v88_v18  ;;  %v1531_v24 = vpop.f32.mrb[1].mxu1  ;;  %v205_v22 = vsub.s32 3, %v1902_v15 }
  0xde   :  { %v142_v27 = vpop.f32.mrb[2].mxu1 }
  0xdf   :  { %v1929_v30 = vadd.f32 %v142_v27, %v88_v18  ;;  %v1532_v31 = vpop.f32.mrb[3].mxu1  ;;  %v160_v32 = vrot.slane %v1918_v23, 7  ;;  %v151_v43 = vrot.slane %v1918_v23, 6  ;;  %v206_v24 = vrot.slane %v1908_v17, %v205_v22 }
  0xe1   :  { %v161_v33 = vrot.slane %v1929_v30, 7  ;;  %v1650_v41 = vpack.i.bf16 %v1929_v30, %v1918_v23  ;;  %v152_v42 = vrot.slane %v1929_v30, 6 }
  0xe3   :  { %v163_v36 = vsel %vm162_vm2, %v160_v32, %v161_v33  ;;  %v164_v37 = vsel %vm162_vm2, %v161_v33, %v160_v32  ;;  %v154_v49 = vsel %vm153_vm5, %v151_v43, %v152_v42  ;;  %v155_v50 = vsel %vm153_vm5, %v152_v42, %v151_v43  ;;  %v2009_v33 = vld [vmem:[%s2371_s1 + $0x4] ss:$8 sps:$4 sm:$0xff]  }
  0xe4   :  { %v167_v38 = vsel %vm1934_vm3, 1.0, %v164_v37  ;;  %v168_v39 = vsel %vm1938_vm4, 1.0, %v163_v36  ;;  %v158_v52 = vsel %vm1958_vm6, 1.0, %v155_v50  ;;  %v159_v53 = vsel %vm1962_vm7, 1.0, %v154_v49  ;;  %v2014_v36 = vld [vmem:[%s2371_s1] ss:$8 sps:$4 sm:$0xff]   ;;  %490 = vmatprep.subr.bf16.mxu0 %v2009_v33 }
  0xe5   :  { %v1645_v40 = vpack.i.bf16 %v168_v39, %v167_v38  ;;  %v2021_v37 = vld [vmem:[%s2371_s1 + $0x14] ss:$8 sps:$4 sm:$0xff]   ;;  %v2026_v38 = vld [vmem:[%s2371_s1 + $0x10] ss:$8 sps:$4 sm:$0xff]   ;;  %v1787_v39 = vmov 0  }
  0xe7   :  { %1646 = vrot.lane.b32.xlu0 %v1645_v40, %s1785_s19  ;;  %v404_v40 = vsub.s32 1, %v1902_v15 }
  0xeb   :  { %1651 = vrot.lane.b32.xlu0 %v1650_v41, %s1786_s20  ;;  %v2034_v41 = vrot.slane %v1908_v17, %v404_v40 }
 0x159   :  { %v1647_v44 = vpop.permute.xlu0 %1646 }
 0x15a   :  { %v1649_v47 = vunpack.i.h.bf16 %v1647_v44  ;;  %v1648_v48 = vunpack.i.l.bf16 %v1647_v44 }
 0x15c   :  { %v185_v56 = vsel %vm101_vm1, %v158_v52, %v1648_v48  ;;  %v186_v57 = vsel %vm101_vm1, %v159_v53, %v1649_v47 }
 0x15d   :  { %v1652_v51 = vpop.permute.xlu0 %1651 }
 0x15e   :  { %v1654_v54 = vunpack.i.h.bf16 %v1652_v51  ;;  %v1653_v55 = vunpack.i.l.bf16 %v1652_v51 }
 0x160   :  { %v188_v58 = vsel %vm187_vm8, %v185_v56, %v1653_v55  ;;  %v189_v59 = vsel %vm187_vm8, %v186_v57, %v1654_v54  ;;  %v2046_v55 = vld [vmem:[%s2373_s3] sm:$0xff]  ;;  %v2051_v56 = vld [vmem:[%s2373_s3 + $0x8] sm:$0xff] }
 0x161   :  { %v190_v60 = vpack.c.bf16 %v189_v59, %v188_v58 }
 0x163   :  { %1546 = vmatmul.mubr.msk.bf16.vlgmr.msra.gmra.mrb[4].mxu1 %vm243_vm9, %v190_v60  ;;  %1562 = vmatmul.mubr.msk.bf16.vlgmr.msra.gmra.mrb[0].mxu0 %vm243_vm9, %v190_v60  ;;  %v2057_v60 = vld [vmem:[%s2373_s3 + $0x10] sm:$0xff] }
 0x164   :  { %1569 = vmatprep.mubr.msk.bf16.mxu1 %vm1784_vm0, %v1783_v1  ;;  %1566 = vmatpush3.bf16.msra.mxu1 %v1985_v61 }
 0x165   :  { %1567 = vmatprep.subr.bf16.mxu1 %v1783_v1  ;;  %491 = vmatpush1.bf16.msra.mxu0 %v2014_v36 }
 0x166   :  { %492 = vmatprep.subr.bf16.mxu0 %v2021_v37  ;;  %522 = vmatprep.mubr.bf16.mxu0 %v1787_v39 }
 0x168   :  { %1568 = vmatpush3.bf16.msra.mxu1 %v1991_v62 }
 0x169   :  { %493 = vmatpush1.bf16.msra.mxu0 %v2026_v38 }
 0x16a   :  { %1573 = vmatprep.subr.bf16.mxu0 %v1783_v1 }
 0x236   :  { %v281_v2 = vpop.f32.mrb[4].mxu1  ;;  %v375_v5 = vpop.f32.mrb[0].mxu0 }
 0x237   :  { %v376_v6 = vadd.f32 %v375_v5, %v304_v0  ;;  %v1547_v7 = vpop.f32.mrb[5].mxu1  ;;  %v1563_v8 = vpop.f32.mrb[1].mxu0  ;;  %v282_v25 = vadd.f32 %v281_v2, %v206_v24 }
 0x238   :  { %v284_v9 = vpop.f32.mrb[6].mxu1  ;;  %v378_v10 = vpop.f32.mrb[2].mxu0 }
 0x239   :  { %v1352_v11 = vmul.f32 -1.442695, %v376_v6  ;;  %v379_v12 = vadd.f32 %v378_v10, %v304_v0  ;;  %v1548_v13 = vpop.f32.mrb[7].mxu1  ;;  %v1564_v14 = vpop.f32.mrb[3].mxu0  ;;  %v285_v27 = vadd.f32 %v284_v9, %v206_v24  ;;  %v2070_v10 = vld [vmem:[%s2372_s2 + $0x40] sm:$0xff]  }
 0x23a   :  { %1455 = vmatprep.subr.bf16.mxu1 %v2070_v10  ;;  %v2087_v13 = vld [vmem:[%s2372_s2 + $0x8] sm:$0xff]   ;;  %v2093_v14 = vld [vmem:[%s2372_s2 + $0x50] sm:$0xff]  }
 0x23b   :  { %1719 = vpow2.f32 %v1352_v11  ;;  %v1353_v16 = vmul.f32 -1.442695, %v379_v12  ;;  %v2075_v11 = vld [vmem:[%s2372_s2] sm:$0xff]   ;;  %v2080_v12 = vld [vmem:[%s2372_s2 + $0x48] sm:$0xff]  }
 0x23d   :  { %1721 = vpow2.f32 %v1353_v16  ;;  %v2099_v16 = vld [vmem:[%s2372_s2 + $0x10] sm:$0xff]  }
 0x245   :  { %v1720_v18 = vpop.eup %1719 }
 0x246   :  { %v388_v19 = vadd.f32 1.0, %v1720_v18 }
 0x247   :  { %v1722_v20 = vpop.eup %1721 }
 0x248   :  { %1723 = vrcp.f32 %v388_v19  ;;  %v389_v21 = vadd.f32 1.0, %v1722_v20 }
 0x24a   :  { %1725 = vrcp.f32 %v389_v21 }
 0x252   :  { %v1724_v26 = vpop.eup %1723 }
 0x253   :  { %v1999_v28 = vmul.f32 %v1724_v26, %v282_v25 }
 0x254   :  { %v1726_v29 = vpop.eup %1725 }
 0x255   :  { %v2001_v31 = vmul.f32 %v1726_v29, %v285_v27 }
 0x257   :  { %v401_v32 = vpack.c.bf16 %v2001_v31, %v1999_v28 }
 0x259   :  { %1570 = vmatmul.mubr.msk.bf16.vlgmr.msra.gmra.mrb[8].mxu1 %vm101_vm1, %v401_v32 }
 0x25a   :  { %1456 = vmatpush3.bf16.msra.mxu1 %v2075_v11 }
 0x25b   :  { %1457 = vmatprep.subr.bf16.mxu1 %v2080_v12 }
 0x25e   :  { %1458 = vmatpush3.bf16.msra.mxu1 %v2087_v13 }
 0x25f   :  { %1459 = vmatprep.subr.bf16.mxu1 %v2093_v14 }
 0x262   :  { %1460 = vmatpush3.bf16.msra.mxu1 %v2099_v16 }
 0x32c   :  { %v455_v42 = vpop.f32.mrb[8].mxu1 }
 0x32d   :  { %v456_v43 = vadd.f32 %v455_v42, %v2034_v41  ;;  %v1571_v44 = vpop.f32.mrb[9].mxu1 }
 0x32e   :  { %v458_v47 = vpop.f32.mrb[10].mxu1 }
 0x32f   :  { %v462_v48 = vadd.f32 %v456_v43, %v1854_v3  ;;  %v459_v49 = vadd.f32 %v458_v47, %v2034_v41  ;;  %v1572_v50 = vpop.f32.mrb[11].mxu1 }
 0x330   :  { %v2118_v50 = vld [vmem:[%s2372_s2 + $0x60] sm:$0xff]  }
 0x331   :  { %v463_v51 = vadd.f32 %v459_v49, %v1859_v4  ;;  %v464_v52 = vmul.f32 0.70710677, %v462_v48  ;;  %v2106_v48 = vld [vmem:[%s2372_s2 + $0x58] sm:$0xff]  }
 0x332   :  { %v2111_v49 = vld [vmem:[%s2372_s2 + $0x18] sm:$0xff]   ;;  %1461 = vmatprep.subr.bf16.mxu1 %v2106_v48 }
 0x333   :  { %v465_v53 = vmul.f32 0.70710677, %v463_v51  ;;  %1462 = vmatpush3.bf16.msra.mxu1 %v2111_v49  ;;  %v2123_v51 = vld [vmem:[%s2372_s2 + $0x20] sm:$0xff]  }
 0x334   :  { %1463 = vmatprep.subr.bf16.mxu1 %v2118_v50 }
 0x335   :  { %v466_v54 = vpack.c.bf16 %v465_v53, %v464_v52  ;;  %v2129_v52 = vld [vmem:[%s2372_s2 + $0x68] sm:$0xff]  }
 0x336   :  { %v2135_v53 = vld [vmem:[%s2372_s2 + $0x28] sm:$0xff]  }
 0x337   :  { %1365 = vmatmul.mubr.msk.bf16.vlgmr.msra.gmra.mrb[4].mxu0 %vm101_vm1, %v466_v54  ;;  %1464 = vmatpush3.bf16.msra.mxu1 %v2123_v51  ;;  %v2141_v54 = vld [vmem:[%s2372_s2 + $0x70] sm:$0xff]  }
 0x338   :  { %1577 = vmatprep.mubr.msk.bf16.mxu0 %vm1784_vm0, %v1783_v1  ;;  %1465 = vmatprep.subr.bf16.mxu1 %v2129_v52 }
 0x33b   :  { %1466 = vmatpush3.bf16.msra.mxu1 %v2135_v53 }
 0x33c   :  { %1467 = vmatprep.subr.bf16.mxu1 %v2141_v54 }
 0x40a   :  { %v524_v57 = vpop.f32.mrb[4].mxu0 }
 0x40b   :  { %v525_v58 = vadd.f32 %v524_v57, %v2046_v55  ;;  %v526_v59 = vpop.f32.mrb[5].mxu0  ;;  %v2147_v57 = vld [vmem:[%s2372_s2 + $0x30] sm:$0xff]  }
 0x40c   :  { %v527_v0 = vadd.f32 %v526_v59, %v2051_v56  ;;  %v528_v2 = vpop.f32.mrb[6].mxu0  ;;  %1468 = vmatpush3.bf16.msra.mxu1 %v2147_v57  ;;  %v2159_v59 = vld [vmem:[%s2372_s2 + $0x38] sm:$0xff]  }
 0x40d   :  { %v530_v5 = vpop.f32.mrb[7].mxu0  ;;  %v529_v6 = vadd.f32 %v528_v2, %v2057_v60 }
 0x40e   :  { %v531_v7 = vadd.f32 %v530_v5, %v2062_v63  ;;  %v533_v8 = vmax.f32 %v525_v58, %v527_v0 }
 0x410   :  { %534 = vmax.xlane.f32.xlu1 %v533_v8  ;;  %v536_v9 = vmax.f32 %v529_v6, %v531_v7 }
 0x414   :  { %537 = vmax.xlane.f32.xlu1 %v536_v9 }
 0x49d   :  { %v535_v18 = vpop.xlane.xlu1 %534 }
 0x49e   :  { %v539_v19 = vsub.f32 %v525_v58, %v535_v18  ;;  %v540_v20 = vsub.f32 %v527_v0, %v535_v18  ;;  %v2153_v58 = vld [vmem:[%s2372_s2 + $0x78] sm:$0xff]  }
 0x49f   :  { %1469 = vmatprep.subr.bf16.mxu1 %v2153_v58 }
 0x4a0   :  { %v543_v21 = vmul.f32 1.442695, %v539_v19  ;;  %v545_v22 = vmul.f32 1.442695, %v540_v20  ;;  %1470 = vmatpush3.bf16.msra.mxu1 %v2159_v59 }
 0x4a1   :  { %v538_v24 = vpop.xlane.xlu1 %537  ;;  %1597 = vmatprep.subr.bf16.mxu1 %v1783_v1 }
 0x4a2   :  { %1727 = vpow2.f32 %v543_v21  ;;  %v541_v25 = vsub.f32 %v529_v6, %v538_v24  ;;  %v542_v26 = vsub.f32 %v531_v7, %v538_v24  ;;  %v2169_v21 = vld [vmem:[%s2374_s4 + $0x20] sm:$0xff]  }
 0x4a3   :  { %1729 = vpow2.f32 %v545_v22  ;;  %1574 = vmatpush3.bf16.msra.mxu0 %v2169_v21  ;;  %v2176_v22 = vld [vmem:[%s2374_s4 + $0x28] sm:$0xff]  }
 0x4a4   :  { %v547_v27 = vmul.f32 1.442695, %v541_v25  ;;  %v549_v29 = vmul.f32 1.442695, %v542_v26  ;;  %1575 = vmatprep.subr.bf16.mxu0 %v1783_v1 }
 0x4a6   :  { %1731 = vpow2.f32 %v547_v27 }
 0x4a7   :  { %1733 = vpow2.f32 %v549_v29  ;;  %1576 = vmatpush3.bf16.msra.mxu0 %v2176_v22 }
 0x4a8   :  { %1581 = vmatprep.subr.bf16.mxu0 %v1783_v1 }
 0x4ac   :  { %v1728_v32 = vpop.eup %1727 }
 0x4ad   :  { %v1730_v40 = vpop.eup %1729 }
 0x4ae   :  { %v551_v42 = vadd.f32 %v1730_v40, %v1728_v32 }
 0x4b0   :  { %v1732_v43 = vpop.eup %1731  ;;  %552 = vadd.xlane.f32.xlu0 %v551_v42  ;;  %v1705_v42 = vld [vmem:[%s2375_s5 + $0x60] sm:$0xff]  }
 0x4b1   :  { %v1734_v44 = vpop.eup %1733 }
 0x4b2   :  { %v554_v47 = vadd.f32 %v1734_v44, %v1732_v43 }
 0x4b4   :  { %555 = vadd.xlane.f32.xlu1 %v554_v47  ;;  %v1708_v47 = vld [vmem:[%s2375_s5 + $0x98] sm:$0xff]  }
 0x53d   :  { %v553_v0 = vpop.xlane.xlu0 %552 }
 0x53e   :  { %1735 = vrcp.f32 %v553_v0  ;;  %v1709_v0 = vld [vmem:[%s2375_s5 + $0x70] sm:$0xff]  }
 0x541   :  { %v556_v2 = vpop.xlane.xlu1 %555 }
 0x542   :  { %1737 = vrcp.f32 %v556_v2  ;;  %v1710_v2 = vld [vmem:[%s2375_s5 + $0xa0] sm:$0xff]  }
 0x548   :  { %v1736_v5 = vpop.eup %1735 }
 0x549   :  { %v559_v7 = vmul.f32 %v1736_v5, %v1730_v40  ;;  %v558_v9 = vmul.f32 %v1736_v5, %v1728_v32  ;;  %v1711_v5 = vld [vmem:[%s2375_s5 + $0x78] sm:$0xff]  }
 0x54c   :  { %v1738_v6 = vpop.eup %1737 }
 0x54d   :  { %v562_v8 = vmul.f32 %v1738_v6, %v1734_v44  ;;  %v561_v18 = vmul.f32 %v1738_v6, %v1732_v43  ;;  %v1706_v43 = vld [vmem:[%s2375_s5 + $0x90] sm:$0xff]   ;;  %v1707_v44 = vld [vmem:[%s2375_s5 + $0x68] sm:$0xff]  }
 0x54e   :  { %v1712_v6 = vld [vmem:[%s2375_s5 + $0xa8] sm:$0xff]  }
 0x54f   :  { %v564_v19 = vpack.c.bf16 %v562_v8, %v559_v7  ;;  %v563_v20 = vpack.c.bf16 %v561_v18, %v558_v9  ;;  %v710_v7 = vsub.s32 2, %v1902_v15 }
 0x551   :  { %693 = vmatprep.mubr.bf16.mxu1 %v564_v19  ;;  %v2217_v8 = vrot.slane %v1908_v17, %v710_v7 }
 0x552   :  { %694 = vmatmul.mubr.bf16.vlgmr.msra.gmra.mrb[12].mxu1 %v563_v20 }
 0x553   :  { %1609 = vmatprep.mubr.msk.bf16.mxu1 %vm1784_vm0, %v1783_v1  ;;  %1598 = vmatpush3.bf16.msra.mxu1 %v1706_v43 }
 0x554   :  { %1599 = vmatprep.subr.bf16.mxu1 %v1783_v1 }
 0x557   :  { %1600 = vmatpush3.bf16.msra.mxu1 %v1708_v47  ;;  %v1716_v47 = vld [vmem:[%s2375_s5 + $0xb8] sm:$0xff]  }
 0x558   :  { %1601 = vmatprep.subr.bf16.mxu1 %v1783_v1 }
 0x55b   :  { %1602 = vmatpush3.bf16.msra.mxu1 %v1710_v2 }
 0x55c   :  { %1603 = vmatprep.subr.bf16.mxu1 %v1783_v1 }
 0x55f   :  { %1604 = vmatpush3.bf16.msra.mxu1 %v1712_v6 }
 0x560   :  { %1605 = vmatprep.subr.bf16.mxu1 %v1783_v1 }
 0x625   :  { %v1471_v24 = vpop.f32.mrb[12].mxu1 }
 0x626   :  { %v1472_v25 = vpop.f32.mrb[13].mxu1 }
 0x627   :  { %v1473_v26 = vadd.f32 %v1472_v25, %v1471_v24  ;;  %v1474_v27 = vpop.f32.mrb[14].mxu1 }
 0x628   :  { %v1475_v29 = vpop.f32.mrb[15].mxu1 }
 0x629   :  { %v1476_v32 = vadd.f32 %v1475_v29, %v1474_v27 }
 0x62b   :  { %v707_v40 = vpack.c.bf16 %v1476_v32, %v1473_v26  ;;  %v1713_v32 = vld [vmem:[%s2375_s5 + $0x80] sm:$0xff]  }
 0x62d   :  { %1578 = vmatmul.mubr.msk.bf16.vlgmr.msra.gmra.mrb[8].mxu0 %vm101_vm1, %v707_v40  ;;  %v1714_v40 = vld [vmem:[%s2375_s5 + $0xb0] sm:$0xff]  }
 0x62e   :  { %1593 = vmatprep.mubr.msk.bf16.mxu0 %vm1784_vm0, %v1783_v1  ;;  %1582 = vmatpush3.bf16.msra.mxu0 %v1705_v42 }
 0x62f   :  { %1583 = vmatprep.subr.bf16.mxu0 %v1783_v1  ;;  %1606 = vmatpush3.bf16.msra.mxu1 %v1714_v40 }
 0x630   :  { %1607 = vmatprep.subr.bf16.mxu1 %v1783_v1 }
 0x632   :  { %1584 = vmatpush3.bf16.msra.mxu0 %v1707_v44 }
 0x633   :  { %1585 = vmatprep.subr.bf16.mxu0 %v1783_v1  ;;  %1608 = vmatpush3.bf16.msra.mxu1 %v1716_v47 }
 0x634   :  { %1621 = vmatprep.subr.bf16.mxu1 %v1783_v1 }
 0x636   :  { %1586 = vmatpush3.bf16.msra.mxu0 %v1709_v0 }
 0x637   :  { %1587 = vmatprep.subr.bf16.mxu0 %v1783_v1 }
 0x63a   :  { %1588 = vmatpush3.bf16.msra.mxu0 %v1711_v5 }
 0x63b   :  { %1589 = vmatprep.subr.bf16.mxu0 %v1783_v1 }
 0x63e   :  { %1590 = vmatpush3.bf16.msra.mxu0 %v1713_v32 }
 0x63f   :  { %1591 = vmatprep.subr.bf16.mxu0 %v1783_v1 }
 0x700   :  { %v761_v9 = vpop.f32.mrb[8].mxu0 }
 0x701   :  { %v762_v18 = vadd.f32 %v761_v9, %v2217_v8  ;;  %v1579_v19 = vpop.f32.mrb[9].mxu0 }
 0x702   :  { %v764_v20 = vpop.f32.mrb[10].mxu0 }
 0x703   :  { %v768_v24 = vadd.f32 %v762_v18, %v1999_v28  ;;  %v765_v25 = vadd.f32 %v764_v20, %v2217_v8  ;;  %v1580_v26 = vpop.f32.mrb[11].mxu0 }
 0x705   :  { %v770_v27 = vmul.f32 0.70710677, %v768_v24  ;;  %v769_v29 = vadd.f32 %v765_v25, %v2001_v31  ;;  %v1715_v31 = vld [vmem:[%s2375_s5 + $0x88] sm:$0xff]  }
 0x706   :  { %1592 = vmatpush3.bf16.msra.mxu0 %v1715_v31 }
 0x707   :  { %v772_v42 = vadd.f32 %v770_v27, %v1918_v23  ;;  %v771_v43 = vmul.f32 0.70710677, %v769_v29  ;;  %1613 = vmatprep.subr.bf16.mxu0 %v1783_v1 }
 0x709   :  { %v2230_v28 = vmul.f32 0.70710677, %v772_v42  ;;  %v773_v44 = vadd.f32 %v771_v43, %v1929_v30 }
 0x70b   :  { %v2241_v23 = vmul.f32 0.70710677, %v773_v44  ;;  %v782_v0 = vrot.slane %v2230_v28, 7  ;;  %v776_v20 = vrot.slane %v2230_v28, 6 }
 0x70d   :  { %v783_v30 = vrot.slane %v2241_v23, 7  ;;  %v1660_v18 = vpack.i.bf16 %v2241_v23, %v2230_v28  ;;  %v777_v19 = vrot.slane %v2241_v23, 6 }
 0x70f   :  { %v784_v2 = vsel %vm162_vm2, %v782_v0, %v783_v30  ;;  %v785_v5 = vsel %vm162_vm2, %v783_v30, %v782_v0  ;;  %v778_v34 = vsel %vm153_vm5, %v776_v20, %v777_v19  ;;  %v779_v35 = vsel %vm153_vm5, %v777_v19, %v776_v20 }
 0x710   :  { %v786_v6 = vsel %vm1934_vm3, 1.0, %v785_v5  ;;  %v787_v7 = vsel %vm1938_vm4, 1.0, %v784_v2  ;;  %v780_v29 = vsel %vm1958_vm6, 1.0, %v779_v35  ;;  %v781_v32 = vsel %vm1962_vm7, 1.0, %v778_v34 }
 0x711   :  { %v1655_v9 = vpack.i.bf16 %v787_v7, %v786_v6 }
 0x713   :  { %1656 = vrot.lane.b32.xlu1 %v1655_v9, %s1785_s19 }
 0x717   :  { %1661 = vrot.lane.b32.xlu1 %v1660_v18, %s1786_s20 }
 0x785   :  { %v1657_v24 = vpop.permute.xlu1 %1656 }
 0x786   :  { %v1659_v25 = vunpack.i.h.bf16 %v1657_v24  ;;  %v1658_v26 = vunpack.i.l.bf16 %v1657_v24 }
 0x788   :  { %v804_v43 = vsel %vm101_vm1, %v780_v29, %v1658_v26  ;;  %v805_v44 = vsel %vm101_vm1, %v781_v32, %v1659_v25  ;;  %v824_v26 = vsub.s32 4, %v1902_v15 }
 0x789   :  { %v1662_v27 = vpop.permute.xlu1 %1661 }
 0x78a   :  { %v1664_v40 = vunpack.i.h.bf16 %v1662_v27  ;;  %v1663_v42 = vunpack.i.l.bf16 %v1662_v27  ;;  %v825_v34 = vrot.slane %v1908_v17, %v824_v26 }
 0x78c   :  { %v806_v31 = vsel %vm187_vm8, %v804_v43, %v1663_v42  ;;  %v807_v47 = vsel %vm187_vm8, %v805_v44, %v1664_v40 }
 0x78d   :  { %v808_v0 = vpack.c.bf16 %v807_v47, %v806_v31 }
 0x78f   :  { %1594 = vmatmul.mubr.msk.bf16.vlgmr.msra.gmra.mrb[12].mxu0 %vm243_vm9, %v808_v0  ;;  %1610 = vmatmul.mubr.msk.bf16.vlgmr.msra.gmra.mrb[16].mxu1 %vm243_vm9, %v808_v0 }
 0x790   :  { %1614 = vmatpush3.bf16.msra.mxu0 %v1985_v61  ;;  %1617 = vmatprep.mubr.msk.bf16.mxu0 %vm1784_vm0, %v1783_v1 }
 0x791   :  { %1615 = vmatprep.subr.bf16.mxu0 %v1783_v1  ;;  %1622 = vmatpush3.bf16.msra.mxu1 %v2169_v21 }
 0x792   :  { %1623 = vmatprep.subr.bf16.mxu1 %v1783_v1  ;;  %1625 = vmatprep.mubr.msk.bf16.mxu1 %vm1784_vm0, %v1783_v1 }
 0x794   :  { %1616 = vmatpush3.bf16.msra.mxu0 %v1991_v62 }
 0x795   :  { %1067 = vmatprep.subr.bf16.mxu0 %v2009_v33  ;;  %1624 = vmatpush3.bf16.msra.mxu1 %v2176_v22 }
 0x796   :  { %1629 = vmatprep.subr.bf16.mxu1 %v1783_v1 }
 0x862   :  { %v899_v61 = vpop.f32.mrb[12].mxu0  ;;  %v993_v30 = vpop.f32.mrb[16].mxu1 }
 0x863   :  { %v994_v21 = vadd.f32 %v993_v30, %v922_v46  ;;  %v1595_v2 = vpop.f32.mrb[13].mxu0  ;;  %v1611_v5 = vpop.f32.mrb[17].mxu1  ;;  %v900_v35 = vadd.f32 %v899_v61, %v825_v34 }
 0x864   :  { %v902_v6 = vpop.f32.mrb[14].mxu0  ;;  %v996_v7 = vpop.f32.mrb[18].mxu1 }
 0x865   :  { %v1427_v9 = vmul.f32 -1.442695, %v994_v21  ;;  %v997_v18 = vadd.f32 %v996_v7, %v922_v46  ;;  %v1596_v62 = vpop.f32.mrb[15].mxu0  ;;  %v1612_v19 = vpop.f32.mrb[19].mxu1  ;;  %v903_v29 = vadd.f32 %v902_v6, %v825_v34 }
 0x867   :  { %1739 = vpow2.f32 %v1427_v9  ;;  %v1428_v33 = vmul.f32 -1.442695, %v997_v18 }
 0x869   :  { %1741 = vpow2.f32 %v1428_v33 }
 0x871   :  { %v1740_v22 = vpop.eup %1739 }
 0x872   :  { %v1006_v20 = vadd.f32 1.0, %v1740_v22 }
 0x873   :  { %v1742_v24 = vpop.eup %1741 }
 0x874   :  { %1743 = vrcp.f32 %v1006_v20  ;;  %v1007_v25 = vadd.f32 1.0, %v1742_v24 }
 0x876   :  { %1745 = vrcp.f32 %v1007_v25 }
 0x87e   :  { %v1744_v27 = vpop.eup %1743 }
 0x87f   :  { %v2291_v32 = vmul.f32 %v1744_v27, %v900_v35 }
 0x880   :  { %v1746_v40 = vpop.eup %1745 }
 0x881   :  { %v2293_v42 = vmul.f32 %v1746_v40, %v903_v29  ;;  %v1717_v40 = vld [vmem:[%s2377_s7] sm:$0xff]  }
 0x883   :  { %v1014_v43 = vpack.c.bf16 %v2293_v42, %v2291_v32 }
 0x885   :  { %1618 = vmatmul.mubr.msk.bf16.vlgmr.msra.gmra.mrb[16].mxu0 %vm101_vm1, %v1014_v43  ;;  %v1718_v43 = vld [vmem:[%s2377_s7 + $0x8] sm:$0xff]   ;;  %s1788_s7 = smov [#allocation2]  }
 0x886   :  { %1068 = vmatpush1.bf16.msra.mxu0 %v2014_v36  ;;  %1099 = vmatprep.mubr.bf16.mxu0 %v1787_v39  ;;  %s1308_s14 = sshll.u32 %s1788_s7, 4  ;;  %s1309_s14 = int_to_ptr.vmem [resolvable:$true] %s1308_s14 }
 0x887   :  { %1069 = vmatprep.subr.bf16.mxu0 %v2021_v37  ;;  %s1759_s15 = scalar_lea.vmem %s1309_s14, 256  ;;  %p1764_p1 = scmp.lt.s32.totalorder %s1309_s14, %s1309_s14 }
 0x888   :  { %p1760_p0 = scmp.ne.s32.totalorder %s1309_s14, %s1759_s15  ;;  %p1765_p2 = scmp.lt.s32.totalorder %s1759_s15, %s1759_s15 }
 0x88a   :  { %1070 = vmatpush1.bf16.msra.mxu0 %v2026_v38  ;;  %p1766_p3 = por %p1765_p2, %p1764_p1 }
 0x88b   :  { %1497 = vmatprep.subr.bf16.mxu0 %v2070_v10 }
 0x88c   :  { %p1767_p4 = pnand %p1766_p3, %p1760_p0 }
 0x958   :  { %v1052_v44 = vpop.f32.mrb[16].mxu0 }
 0x959   :  { %v1053_v31 = vadd.f32 %v1052_v44, %v2034_v41  ;;  %v1619_v47 = vpop.f32.mrb[17].mxu0 }
 0x95a   :  { %v1055_v0 = vpop.f32.mrb[18].mxu0 }
 0x95b   :  { %v1059_v45 = vadd.f32 %v1053_v31, %v1854_v3  ;;  %v1056_v46 = vadd.f32 %v1055_v0, %v2034_v41  ;;  %v1620_v61 = vpop.f32.mrb[19].mxu0 }
 0x95d   :  { %v1060_v36 = vadd.f32 %v1056_v46, %v1859_v4  ;;  %v1061_v30 = vmul.f32 0.70710677, %v1059_v45 }
 0x95f   :  { %v1062_v39 = vmul.f32 0.70710677, %v1060_v36 }
 0x961   :  { %v1063_v21 = vpack.c.bf16 %v1062_v39, %v1061_v30 }
 0x963   :  { %1430 = vmatmul.mubr.msk.bf16.vlgmr.msra.gmra.mrb[20].mxu0 %vm101_vm1, %v1063_v21 }
 0x964   :  { %1498 = vmatpush3.bf16.msra.mxu0 %v2075_v11 }
 0x965   :  { %1499 = vmatprep.subr.bf16.mxu0 %v2080_v12 }
 0x968   :  { %1500 = vmatpush3.bf16.msra.mxu0 %v2087_v13 }
 0x969   :  { %1501 = vmatprep.subr.bf16.mxu0 %v2093_v14 }
 0x96c   :  { %1502 = vmatpush3.bf16.msra.mxu0 %v2099_v16 }
 0x96d   :  { %1503 = vmatprep.subr.bf16.mxu0 %v2106_v48 }
 0x970   :  { %1504 = vmatpush3.bf16.msra.mxu0 %v2111_v49 }
 0x971   :  { %1505 = vmatprep.subr.bf16.mxu0 %v2118_v50 }
 0x974   :  { %1506 = vmatpush3.bf16.msra.mxu0 %v2123_v51 }
 0x975   :  { %1507 = vmatprep.subr.bf16.mxu0 %v2129_v52 }
 0x978   :  { %1508 = vmatpush3.bf16.msra.mxu0 %v2135_v53 }
 0x979   :  { %1509 = vmatprep.subr.bf16.mxu0 %v2141_v54 }
 0x97c   :  { %1510 = vmatpush3.bf16.msra.mxu0 %v2147_v57 }
 0x97d   :  { %1511 = vmatprep.subr.bf16.mxu0 %v2153_v58 }
 0x980   :  { %1512 = vmatpush3.bf16.msra.mxu0 %v2159_v59 }
 0xa36   :  { %v1101_v3 = vpop.f32.mrb[20].mxu0 }
 0xa37   :  { %v1102_v4 = vadd.f32 %v1101_v3, %v2046_v55  ;;  %v1103_v37 = vpop.f32.mrb[21].mxu0 }
 0xa38   :  { %v1104_v38 = vadd.f32 %v1103_v37, %v2051_v56  ;;  %v1105_v41 = vpop.f32.mrb[22].mxu0 }
 0xa39   :  { %v1106_v10 = vadd.f32 %v1105_v41, %v2057_v60  ;;  %v1107_v11 = vpop.f32.mrb[23].mxu0 }
 0xa3a   :  { %v1108_v12 = vadd.f32 %v1107_v11, %v2062_v63  ;;  %v1110_v13 = vmax.f32 %v1102_v4, %v1104_v38 }
 0xa3c   :  { %1111 = vmax.xlane.f32.xlu1 %v1110_v13  ;;  %v1113_v14 = vmax.f32 %v1106_v10, %v1108_v12 }
 0xa3e   :  { %1114 = vmax.xlane.f32.xlu0 %v1113_v14 }
 0xac9   :  { %v1112_v16 = vpop.xlane.xlu1 %1111 }
 0xaca   :  { %v1116_v48 = vsub.f32 %v1102_v4, %v1112_v16  ;;  %v1117_v49 = vsub.f32 %v1104_v38, %v1112_v16  ;;  %v1239_v38 = vsub.s32 7, %v1902_v15 }
 0xacb   :  { %v1115_v50 = vpop.xlane.xlu0 %1114 }
 0xacc   :  { %v1120_v51 = vmul.f32 1.442695, %v1116_v48  ;;  %v1122_v52 = vmul.f32 1.442695, %v1117_v49  ;;  %v1118_v55 = vsub.f32 %v1106_v10, %v1115_v50  ;;  %v1119_v53 = vsub.f32 %v1108_v12, %v1115_v50 }
 0xace   :  { %1747 = vpow2.f32 %v1120_v51  ;;  %v1124_v56 = vmul.f32 1.442695, %v1118_v55  ;;  %v1126_v54 = vmul.f32 1.442695, %v1119_v53 }
 0xacf   :  { %1749 = vpow2.f32 %v1122_v52 }
 0xad0   :  { %1751 = vpow2.f32 %v1124_v56 }
 0xad1   :  { %1753 = vpow2.f32 %v1126_v54 }
 0xad8   :  { %v1748_v60 = vpop.eup %1747 }
 0xad9   :  { %v1750_v63 = vpop.eup %1749 }
 0xada   :  { %v1752_v57 = vpop.eup %1751  ;;  %v1128_v58 = vadd.f32 %v1750_v63, %v1748_v60 }
 0xadb   :  { %v1754_v59 = vpop.eup %1753 }
 0xadc   :  { %1129 = vadd.xlane.f32.xlu0 %v1128_v58  ;;  %v1131_v2 = vadd.f32 %v1754_v59, %v1752_v57 }
 0xae0   :  { %1132 = vadd.xlane.f32.xlu0 %v1131_v2 }
 0xb69   :  { %v1130_v5 = vpop.xlane.xlu0 %1129 }
 0xb6a   :  { %1755 = vrcp.f32 %v1130_v5 }
 0xb6d   :  { %v1133_v6 = vpop.xlane.xlu0 %1132 }
 0xb6e   :  { %1757 = vrcp.f32 %v1133_v6 }
 0xb74   :  { %v1756_v7 = vpop.eup %1755 }
 0xb75   :  { %v1136_v9 = vmul.f32 %v1756_v7, %v1750_v63  ;;  %v1135_v18 = vmul.f32 %v1756_v7, %v1748_v60 }
 0xb77   :  { %1300 = vst [vmem:[%s2379_s9 + $0x8] sm:$0xff] %v1136_v9  ;;  %1299 = vst [vmem:[%s2379_s9] sm:$0xff] %v1135_v18 }
 0xb78   :  { %v1758_v62 = vpop.eup %1757 }
 0xb79   :  { %v1139_v19 = vmul.f32 %v1758_v62, %v1754_v59  ;;  %v1138_v33 = vmul.f32 %v1758_v62, %v1752_v57 }
 0xb7b   :  { %v1141_v22 = vpack.c.bf16 %v1139_v19, %v1136_v9  ;;  %1302 = vst [vmem:[%s2379_s9 + $0x18] sm:$0xff] %v1139_v19  ;;  %v1140_v20 = vpack.c.bf16 %v1138_v33, %v1135_v18  ;;  %1301 = vst [vmem:[%s2379_s9 + $0x10] sm:$0xff] %v1138_v33 }
 0xb7d   :  { %1174 = vmatprep.mubr.bf16.mxu0 %v1141_v22 }
 0xb7e   :  { %1175 = vmatmul.mubr.bf16.vlgmr.msra.gmra.mrb[24].mxu0 %v1140_v20 }
 0xc51   :  { %v1513_v24 = vpop.f32.mrb[24].mxu0 }
 0xc52   :  { %v1514_v25 = vpop.f32.mrb[25].mxu0 }
 0xc53   :  { %v1515_v26 = vadd.f32 %v1514_v25, %v1513_v24  ;;  %v1516_v34 = vpop.f32.mrb[26].mxu0 }
 0xc54   :  { %v1517_v35 = vpop.f32.mrb[27].mxu0 }
 0xc55   :  { %v1518_v27 = vadd.f32 %v1517_v35, %v1516_v34 }
 0xc57   :  { %v1183_v29 = vpack.c.bf16 %v1518_v27, %v1515_v26 }
 0xc59   :  { %1626 = vmatmul.mubr.msk.bf16.vlgmr.msra.gmra.mrb[20].mxu1 %vm101_vm1, %v1183_v29 }
 0xc5a   :  { %1633 = vmatprep.mubr.msk.bf16.mxu1 %vm1784_vm0, %v1783_v1  ;;  %1630 = vmatpush3.bf16.msra.mxu1 %v1717_v40 }
 0xc5b   :  { %1631 = vmatprep.subr.bf16.mxu1 %v1783_v1 }
 0xc5e   :  { %1632 = vmatpush3.bf16.msra.mxu1 %v1718_v43 }
 0xd2c   :  { %v1221_v44 = vpop.f32.mrb[20].mxu1 }
 0xd2d   :  { %v1222_v31 = vadd.f32 %v1221_v44, %v2217_v8  ;;  %v1627_v47 = vpop.f32.mrb[21].mxu1 }
 0xd2e   :  { %v1224_v0 = vpop.f32.mrb[22].mxu1 }
 0xd2f   :  { %v1228_v45 = vadd.f32 %v1222_v31, %v2291_v32  ;;  %v1225_v46 = vadd.f32 %v1224_v0, %v2217_v8  ;;  %v1628_v61 = vpop.f32.mrb[23].mxu1  ;;  %v1240_v32 = vrot.slane %v1908_v17, %v1239_v38 }
 0xd31   :  { %v1230_v36 = vmul.f32 0.70710677, %v1228_v45  ;;  %v1229_v30 = vadd.f32 %v1225_v46, %v2293_v42 }
 0xd33   :  { %v1232_v1 = vadd.f32 %v1230_v36, %v2230_v28  ;;  %v1231_v39 = vmul.f32 0.70710677, %v1229_v30 }
 0xd35   :  { %v1233_v21 = vadd.f32 %v1231_v39, %v2241_v23  ;;  %v1234_v3 = vmul.f32 0.70710677, %v1232_v1 }
 0xd37   :  { %v1235_v4 = vmul.f32 0.70710677, %v1233_v21 }
 0xd39   :  { %v1236_v37 = vpack.c.bf16 %v1235_v4, %v1234_v3 }
 0xd3b   :  { %1634 = vmatmul.mubr.msk.bf16.vlgmr.msra.gmra.mrb[24].mxu1 %vm101_vm1, %v1236_v37 }
 0xe0e   :  { %v1290_v8 = vpop.f32.mrb[24].mxu1 }
 0xe0f   :  { %v1291_v41 = vadd.f32 %v1290_v8, %v1240_v32  ;;  %v1635_v10 = vpop.f32.mrb[25].mxu1 }
 0xe10   :  { %v1293_v42 = vpop.f32.mrb[26].mxu1 }
 0xe11   :  { %1297 = vst [vmem:[#allocation2] sm:$0xff] %v1291_v41  ;;  %v1294_v28 = vadd.f32 %v1293_v42, %v1240_v32  ;;  %v1636_v11 = vpop.f32.mrb[27].mxu1 }
 0xe13   :  { %1298 = vst [vmem:[#allocation2 + $0x8] sm:$0xff] %v1294_v28 }
 0xe14   :  { %1770 = shalt.err (!%p1767_p4)
}
 0xe15   :  { %s1771_s0 = scalar_lea.hbm %s2378_s8, 256 }
 0xe16   :  { %p1772_p5 = scmp.ne.s32.totalorder %s2378_s8, %s1771_s0  ;;  %p1775_p6 = scmp.lt.u32.totalorder %s1771_s0, %s2378_s8 }
 0xe18   :  { %p1777_p7 = pnand %p1775_p6, %p1772_p5 }
 0xe1a   :  { %1780 = shalt.err (!%p1777_p7)
}
 0xe1b   :  { %s1789_s22 = smov 128   ;;  %s1790_s23 = smov 8  }
 0xe1c   :  { %1314 = dma.vmem_to_hbm [thread:$0]  %s1309_s14, 256, %s2378_s8, [#allocation3], %s1789_s22, %s1789_s22, %s1790_s23  }
 0xe1d   :  { %1781 = dma.done.wait [#allocation3], 256  }
 0xe1e   :  { %1782 = vsyncadd [#allocation3], 4294967040 }
 0xe1f   :  { %1322 = vsyncpa [#allocation3], 1 }

</bundles_post_ra>
